<compile_context>
chip_gen: v5e
topology: v5e:2x2
jax: 0.10.0
libtpu: 0.0.40
codegen_flags: <defaults>
</compile_context>

<pallas_src>
import jax
import jax.numpy as jnp
from jax.experimental import pallas as pl
from jax.experimental.pallas import tpu as pltpu


def _bcast_copy_kernel(tab_ref, o_ref):
    # tab_ref: (tile_n, W) tile of the flattened table (already in out dtype).
    # o_ref:   (tile_b, tile_n, W) output tile (same rows for every batch row).
    #
    # Explicit per-batch stores: each iteration is an independent VMEM->vreg
    # load + full-lane vst stream, so no block-sized value stays live across
    # iterations.  Trailing partial row tiles load padded/garbage table rows;
    # the matching out-of-bounds output writes are masked by Pallas on
    # writeback, so this is benign — do not "fix" it by reading the pad.
    for b in range(o_ref.shape[0]):
        o_ref[b] = tab_ref[...]


def _choose_lane_width(padded_total):
    """Widest W = 128*k (k <= 16) that divides the padded flattened length."""
    for k in (16, 8, 4, 2, 1):
        w = 128 * k
        if padded_total % w == 0:
            return w
    return 128  # unreachable: padded_total is a multiple of 128 by construction


def _choose_tiles(rows, row_bytes, batch, target_block_bytes=4 << 20):
    """Pick (tile_n, tile_b) so the output block is ~target_block_bytes,
    independent of the total batch size, and the row axis keeps >= 2 parallel
    steps for large outputs (v7x has 2 TensorCores)."""
    tile_b = min(batch, 8)
    tile_n = max(8, (target_block_bytes // max(1, tile_b * row_bytes)) // 8 * 8)
    if tile_n >= rows:
        tile_n = rows                               # full extent: always legal
        total_out_bytes = batch * rows * row_bytes
        if total_out_bytes > (2 << 20) and rows >= 16:
            # Split the (parallel) row axis so both TCs get writeback work.
            half = -(-rows // 2)                    # ceil(rows / 2)
            tile_n = min(rows, ((half + 7) // 8) * 8)
    return tile_n, tile_b


def _broadcast_rows(table, batch):
    """Return out[b, n, c] = table[n, c] for all b (same dtype as `table`)."""
    rows, width = table.shape
    itemsize = jnp.dtype(table.dtype).itemsize
    tile_n, tile_b = _choose_tiles(rows, width * itemsize, batch)
    grid = (pl.cdiv(rows, tile_n), pl.cdiv(batch, tile_b))   # batch = inner axis

    return pl.pallas_call(
        _bcast_copy_kernel,
        out_shape=jax.ShapeDtypeStruct((batch, rows, width), table.dtype),
        grid=grid,
        in_specs=[
            # Table block index is constant across the inner batch axis, so
            # each row tile is DMA'd from HBM exactly once (no per-batch
            # re-fetch).
            pl.BlockSpec((tile_n, width), lambda n, b: (n, 0)),
        ],
        out_specs=pl.BlockSpec((tile_b, tile_n, width), lambda n, b: (b, n, 0)),
        compiler_params=pltpu.CompilerParams(
            dimension_semantics=("parallel", "arbitrary"),
            vmem_limit_bytes=48 << 20,   # headroom on v7x (64 MiB physical VMEM)
        ),
    )(table)


def learnable_positional_encoding_1d(x, emb_table):
    """Returns positional embeddings with the same shape and dtype as x.

    x:         (B, S, D) — only its shape/dtype matter (matches the PyTorch module)
    emb_table: (max_len, D) learnable embedding weight
    """
    B, S, D = x.shape
    max_len, D2 = emb_table.shape
    assert D == D2, "feature dims must match"
    assert S <= max_len, "seq_len exceeds max_len"

    # Cast the tiny (S, D) table once in the wrapper; the kernel is a pure copy.
    table = emb_table[:S].astype(x.dtype)

    total = S * D
    padded_total = pl.cdiv(total, 128) * 128
    flat = table.reshape(total)
    if padded_total != total:
        # Pad so every kernel store is a full-lane unmasked vst; the pad is
        # tiny, lives outside the kernel, and is sliced off below.
        flat = jnp.pad(flat, (0, padded_total - total))

    width = _choose_lane_width(padded_total)
    rows = padded_total // width
    flat = flat.reshape(rows, width)

    out = _broadcast_rows(flat, B)                  # (B, rows, width)
    out = out.reshape(B, padded_total)
    if padded_total != total:
        out = out[:, :total]
    return out.reshape(B, S, D)


def _reference(x, emb_table):
    _, S, _ = x.shape
    pos_emb = emb_table[:S]                         # (S, D)
    return jnp.broadcast_to(pos_emb[None], x.shape).astype(x.dtype)


if __name__ == "__main__":
    key = jax.random.PRNGKey(0)
    k_emb, k_x = jax.random.split(key)

    # Module params: nn.Embedding(max_len, input_size)
    batch, seq_len, input_size, max_len = 2, 8, 32, 1000
    emb_table = jax.random.normal(k_emb, (max_len, input_size), dtype=jnp.float32)

    # Example input (values irrelevant to output, only shape/dtype are used).
    x = jax.random.normal(k_x, (batch, seq_len, input_size), dtype=jnp.float32)

    out = learnable_positional_encoding_1d(x, emb_table)
    out = jax.block_until_ready(out)

    ref = _reference(x, emb_table)
    assert out.shape == x.shape and out.dtype == x.dtype
    assert jnp.array_equal(out, ref), "mismatch vs reference"

    print("KERNEL_OK")
</pallas_src>

<mosaic_0001>
module attributes {stable_mosaic.version = 11 : i64} {
  func.func @_bcast_copy_kernel(%arg0: i32, %arg1: i32, %arg2: memref<1x256xf32, #tpu.memory_space<vmem>>, %arg3: memref<2x1x256xf32, #tpu.memory_space<vmem>>) attributes {dimension_semantics = [#tpu.dimension_semantics<parallel>, #tpu.dimension_semantics<arbitrary>], iteration_bounds = array<i64: 1, 1>, scalar_prefetch = 0 : i64, scratch_operands = 0 : i64, tpu.core_type = #tpu.core_type<tc>, window_params = [{transform_indices = @transform_0, window_bounds = array<i64: 1, 256>}, {transform_indices = @transform_1, window_bounds = array<i64: 2, 1, 256>}]} {
    %c0 = arith.constant 0 : index
    %c0_0 = arith.constant 0 : index
    %0 = vector.load %arg2[%c0, %c0_0] : memref<1x256xf32, #tpu.memory_space<vmem>>, vector<1x256xf32>
    %c0_1 = arith.constant 0 : index
    %c0_2 = arith.constant 0 : index
    %c0_3 = arith.constant 0 : index
    %1 = vector.load %arg3[%c0_1, %c0_2, %c0_3] : memref<2x1x256xf32, #tpu.memory_space<vmem>>, vector<1x1x256xf32>
    %2 = vector.shape_cast %1 : vector<1x1x256xf32> to vector<1x256xf32>
    %3 = vector.shape_cast %0 : vector<1x256xf32> to vector<1x1x256xf32>
    tpu.vector_store %arg3[%c0_1, %c0_2, %c0_3], %3 {strides = array<i32>} : memref<2x1x256xf32, #tpu.memory_space<vmem>>, vector<1x1x256xf32>,
    %c0_4 = arith.constant 0 : index
    %c0_5 = arith.constant 0 : index
    %4 = vector.load %arg2[%c0_4, %c0_5] : memref<1x256xf32, #tpu.memory_space<vmem>>, vector<1x256xf32>
    %c1 = arith.constant 1 : index
    %c0_6 = arith.constant 0 : index
    %c0_7 = arith.constant 0 : index
    %5 = vector.load %arg3[%c1, %c0_6, %c0_7] : memref<2x1x256xf32, #tpu.memory_space<vmem>>, vector<1x1x256xf32>
    %6 = vector.shape_cast %5 : vector<1x1x256xf32> to vector<1x256xf32>
    %7 = vector.shape_cast %4 : vector<1x256xf32> to vector<1x1x256xf32>
    tpu.vector_store %arg3[%c1, %c0_6, %c0_7], %7 {strides = array<i32>} : memref<2x1x256xf32, #tpu.memory_space<vmem>>, vector<1x1x256xf32>,
    return
  }
  func.func @transform_0(%arg0: i32, %arg1: i32) -> (i32, i32) {
    %c0_i32 = arith.constant 0 : i32
    %c0_i32_0 = arith.constant 0 : i32
    return %arg0, %c0_i32 : i32, i32
  }
  func.func @transform_1(%arg0: i32, %arg1: i32) -> (i32, i32, i32) {
    %c0_i32 = arith.constant 0 : i32
    %c0_i32_0 = arith.constant 0 : i32
    return %arg1, %arg0, %c0_i32 : i32, i32, i32
  }
}

</mosaic_0001>

<bundles_post_ra>
// kernel: tpu_custom_call.1
= control target key start
LH: loop header
LB: loop body
LE: loop exit
PB: predicated region body
PF: predicated region fallthrough
CT: control target
= control target key end

     0   :  { %6 = vsyncpa [#allocation3], 0  ;;  %s127_s0 = inlined_call_operand.hbm [shape: f32[1,256], index: 0, kind: input, shape index: {}]   ;;  %s128_s1 = inlined_call_operand.hbm [shape: f32[2,1,256], index: 1, kind: output, shape index: {}]  }
   0x1   :  { %7 = vsyncpa [#allocation4], 0  ;;  %s13_s8 = sshll.u32 %s127_s0, 4  ;;  %s107_s9 = smov [#allocation2]   ;;  %s14_s8 = int_to_ptr.hbm [resolvable:$true] %s13_s8 }
   0x2   :  { %s15_s10 = sshll.u32 %s107_s9, 4  ;;  %s16_s10 = int_to_ptr.vmem [resolvable:$true] %s15_s10 }
   0x3   :  { %18 = dma.hbm_to_vmem [thread:$0]  %s14_s8, 32, %s16_s10, [#allocation3]  }
   0x4   :  { %103 = dma.done.wait [#allocation3], 32  }
   0x5   :  { %104 = vsyncadd [#allocation3], 4294967264  ;;  %v24_v0 = vlaneseq  ;;  %s108_s11 = smov [#allocation5]   ;;  %s38_s15 = sshll.u32 %s128_s1, 4  ;;  %v23_v1 = vld [vmem:[#allocation2] sm:$0x3]  ;;  %s39_s15 = int_to_ptr.hbm [resolvable:$true] %s38_s15 }
   0x6   :  { %s36_s12 = sshll.u32 %s108_s11, 4  ;;  %v29_v2 = vld [vmem:[#allocation2] sm:$0x3]  ;;  %s109_s0 = smov 32   ;;  %s37_s12 = int_to_ptr.vmem [resolvable:$true] %s36_s12 }
   0x7   :  { %vm26_vm0 = vcmp.lt.s32.totalorder %v24_v0, 256  ;;  %s110_s16 = smov 2  }
   0x8   :  { %28 = vst.msk [vmem:[#allocation5] sm:$0x3] %vm26_vm0, %v23_v1 }
   0x9   :  { %31 = vst.msk [vmem:[#allocation5 + $0x2] sm:$0x3] %vm26_vm0, %v29_v2 }
   0xa   :  { %44 = dma.vmem_to_hbm [thread:$0]  %s37_s12, 64, %s39_s15, [#allocation4], %s109_s0, %s109_s0, %s110_s16  }
   0xb   :  { %105 = dma.done.wait [#allocation4], 64  }
   0xc   :  { %106 = vsyncadd [#allocation4], 4294967232 }
   0xd   :  { %49 = vsyncpa [#allocation3], 1 }
   0xe   :  { %50 = vsyncpa [#allocation4], 1 }

</bundles_post_ra>
